<compile_context>
chip_gen: v5e
topology: v5e:2x2
jax: 0.10.0
libtpu: 0.0.40
codegen_flags: <defaults>
</compile_context>

<pallas_src>
import functools
import math

import jax
import jax.numpy as jnp
from jax.experimental import pallas as pl
from jax.experimental.pallas import tpu as pltpu

HIDDEN = 64        # logical hidden width (matches the PyTorch module)
LANE = 128         # TPU lane width
SUBLANE_BF16 = 16  # bf16 rows per vreg (sublane pack)


def _round_up(n, m):
    return ((n + m - 1) // m) * m


def _mlp_kernel(x_ref, w1_ref, b1_ref, w2_ref, b2_ref, w3_ref, b3_ref, o_ref, *, out_size):
    # x arrives f32; cast to the bf16 matmul dtype in-kernel (cheap VPU pack) instead of
    # a separate wrapper-side XLA cast pass over HBM.
    x = x_ref[...].astype(w1_ref.dtype)
    # fc1 + ReLU: bf16 operands on the MXU, f32 accumulate, f32 elementwise on the VPU.
    h1 = jnp.dot(x, w1_ref[...], preferred_element_type=jnp.float32)
    h1 = jnp.maximum(h1 + b1_ref[...], 0.0)
    # fc2 + ReLU
    h2 = jnp.dot(h1.astype(w2_ref.dtype), w2_ref[...], preferred_element_type=jnp.float32)
    h2 = jnp.maximum(h2 + b2_ref[...], 0.0)
    # fc3: lane-padded matmul (N=128, MXU-native) + bias, but only the real out_size
    # columns are written back (narrow masked store) -> minimal HBM writeback.
    out = jnp.dot(h2.astype(w3_ref.dtype), w3_ref[...], preferred_element_type=jnp.float32)
    out = out + b3_ref[...]
    o_ref[...] = out[:, :out_size].astype(o_ref.dtype)


def prepare_params(params, compute_dtype=jnp.bfloat16):
    """Pad hidden/output dims to lane-dense (multiple-of-128) widths and cast matmul
    operands to the compute dtype. Biases stay f32 (bias-add/ReLU run in f32 on the VPU).
    Zero padding leaves results on the real lanes bit-identical.
    NOTE: if bf16 rounding ever flips greedy argmax over Q-values, pass
    compute_dtype=jnp.float32 (fc3 is tiny and not on the perf critical path)."""
    w1, b1 = params["w1"], params["b1"]
    w2, b2 = params["w2"], params["b2"]
    w3, b3 = params["w3"], params["b3"]
    in_size, hid = w1.shape
    out_size = w3.shape[1]
    hid_pad = _round_up(hid, LANE)
    out_pad = _round_up(out_size, LANE)

    w1p = jnp.zeros((in_size, hid_pad), jnp.float32).at[:, :hid].set(w1)
    b1p = jnp.zeros((1, hid_pad), jnp.float32).at[:, :hid].set(b1)
    w2p = jnp.zeros((hid_pad, hid_pad), jnp.float32).at[:hid, :hid].set(w2)
    b2p = jnp.zeros((1, hid_pad), jnp.float32).at[:, :hid].set(b2)
    w3p = jnp.zeros((hid_pad, out_pad), jnp.float32).at[:hid, :out_size].set(w3)
    b3p = jnp.zeros((1, out_pad), jnp.float32).at[:, :out_size].set(b3)

    return {
        "w1": w1p.astype(compute_dtype), "b1": b1p,
        "w2": w2p.astype(compute_dtype), "b2": b2p,
        "w3": w3p.astype(compute_dtype), "b3": b3p,
        "out_size": out_size,
    }


def deep_q_network2_forward(x, prepared, *, tile_b=2048):
    """x: (B, input_size) float32. prepared: output of prepare_params()."""
    w1, b1 = prepared["w1"], prepared["b1"]
    w2, b2 = prepared["w2"], prepared["b2"]
    w3, b3 = prepared["w3"], prepared["b3"]
    out_size = prepared["out_size"]

    B, in_size = x.shape

    # Batch tiling:
    #  * default 2048-row tiles: fewer, larger grid steps / DMAs (per-step footprint is
    #    still only ~1-2 MiB, far under any generation's VMEM budget).
    #  * cap at ~half the (8-rounded) batch so the grid keeps >= 2 steps -> "parallel"
    #    batch axis shards across v7x's 2 TensorCores (v5e/v6e single-TC, unaffected).
    #  * tile rows are a multiple of 16 (bf16 sublane pack) unless a single tile covers
    #    the whole batch. tb is always a multiple of 8 or equals b_pad -> (8,128) rule OK.
    b8 = _round_up(B, 8)
    half = _round_up((b8 + 1) // 2, SUBLANE_BF16)
    tb = max(min(tile_b, half), 8)
    if tb >= b8:
        tb = b8
    b_pad = _round_up(B, tb)

    xp = x
    if b_pad != B:
        xp = jnp.zeros((b_pad, in_size), x.dtype).at[:B].set(x)
    # x stays f32 in HBM; the bf16 cast happens inside the kernel (no extra HBM pass).

    grid = (b_pad // tb,)
    # Constant index_map -> same block every iteration -> weights stay VMEM-resident.
    resident = lambda a: pl.BlockSpec(a.shape, lambda i: (0,) * a.ndim)

    kernel = functools.partial(_mlp_kernel, out_size=out_size)

    out = pl.pallas_call(
        kernel,
        out_shape=jax.ShapeDtypeStruct((b_pad, out_size), jnp.float32),
        grid=grid,
        in_specs=[
            pl.BlockSpec((tb, in_size), lambda i: (i, 0)),  # full last dim -> rule OK
            resident(w1), resident(b1),
            resident(w2), resident(b2),
            resident(w3), resident(b3),
        ],
        # Narrow (real out_size) output block: full last dim satisfies the (8,128) rule.
        out_specs=pl.BlockSpec((tb, out_size), lambda i: (i, 0)),
        compiler_params=pltpu.CompilerParams(
            dimension_semantics=("parallel",),   # batch tiles shard across v7x's 2 TCs
            vmem_limit_bytes=32 << 20,           # ample for tb<=8192; safe on v7x (64 MiB)
        ),
    )(xp, w1, b1, w2, b2, w3, b3)

    return out[:B]


def init_params(key, input_size, output_size):
    """Deterministic init mirroring the PyTorch module's __init__.

    fc1/fc2 weights: kaiming_uniform_(nonlinearity='relu') -> U(-b, b), b = sqrt(6/fan_in).
    fc3 weight and all biases: PyTorch Linear default U(-1/sqrt(fan_in), 1/sqrt(fan_in)).
    Weights are stored transposed: shape (fan_in, fan_out). All f32 (unpadded)."""
    k1, k2, k3, kb1, kb2, kb3 = jax.random.split(key, 6)

    def kaiming_u(k, fan_in, fan_out):
        bound = math.sqrt(6.0 / fan_in)  # gain=sqrt(2), bound = gain*sqrt(3/fan_in)
        return jax.random.uniform(k, (fan_in, fan_out), jnp.float32, -bound, bound)

    def default_u(k, shape, fan_in):
        bound = 1.0 / math.sqrt(fan_in)
        return jax.random.uniform(k, shape, jnp.float32, -bound, bound)

    return {
        "w1": kaiming_u(k1, input_size, HIDDEN),
        "b1": default_u(kb1, (1, HIDDEN), input_size),
        "w2": kaiming_u(k2, HIDDEN, HIDDEN),
        "b2": default_u(kb2, (1, HIDDEN), HIDDEN),
        "w3": default_u(k3, (HIDDEN, output_size), HIDDEN),
        "b3": default_u(kb3, (1, output_size), HIDDEN),
    }


def reference_forward(x, p):
    h1 = jnp.maximum(x @ p["w1"] + p["b1"], 0.0)
    h2 = jnp.maximum(h1 @ p["w2"] + p["b2"], 0.0)
    return h2 @ p["w3"] + p["b3"]


if __name__ == "__main__":
    key = jax.random.PRNGKey(0)
    kx1, kx2, kp = jax.random.split(key, 3)

    input_size, output_size = 4, 2
    params = init_params(kp, input_size, output_size)
    prepared = prepare_params(params)  # pad + cast once (reused across calls)

    # Single-tile path (tiny batch).
    x_small = jax.random.normal(kx1, (8, input_size), jnp.float32)
    out_small = jax.block_until_ready(deep_q_network2_forward(x_small, prepared))
    ref_small = reference_forward(x_small, params)
    assert out_small.shape == (8, output_size)
    # bf16 matmul operands (f32 accumulation) -> loosened tolerance vs f32 reference.
    assert jnp.allclose(out_small, ref_small, atol=5e-2, rtol=5e-2), "small-batch mismatch"

    # Multi-tile path (exercises 2-step grid, batch padding and row slicing).
    x_multi = jax.random.normal(kx2, (40, input_size), jnp.float32)
    out_multi = jax.block_until_ready(deep_q_network2_forward(x_multi, prepared))
    ref_multi = reference_forward(x_multi, params)
    assert out_multi.shape == (40, output_size)
    assert jnp.allclose(out_multi, ref_multi, atol=5e-2, rtol=5e-2), "multi-tile mismatch"

    print("KERNEL_OK")
</pallas_src>

<mosaic_0001>
module attributes {stable_mosaic.version = 11 : i64} {
  func.func @_mlp_kernel(%arg0: i32, %arg1: memref<8x4xf32, #tpu.memory_space<vmem>>, %arg2: memref<4x128xbf16, #tpu.memory_space<vmem>>, %arg3: memref<1x128xf32, #tpu.memory_space<vmem>>, %arg4: memref<128x128xbf16, #tpu.memory_space<vmem>>, %arg5: memref<1x128xf32, #tpu.memory_space<vmem>>, %arg6: memref<128x128xbf16, #tpu.memory_space<vmem>>, %arg7: memref<1x128xf32, #tpu.memory_space<vmem>>, %arg8: memref<8x2xf32, #tpu.memory_space<vmem>>) attributes {dimension_semantics = [#tpu.dimension_semantics<parallel>], iteration_bounds = array<i64: 1>, scalar_prefetch = 0 : i64, scratch_operands = 0 : i64, tpu.core_type = #tpu.core_type<tc>, window_params = [{transform_indices = @transform_0, window_bounds = array<i64: 8, 4>}, {pipeline_mode = #tpu.pipeline_mode<synchronous>, transform_indices = @transform_1, window_bounds = array<i64: 4, 128>}, {pipeline_mode = #tpu.pipeline_mode<synchronous>, transform_indices = @transform_2, window_bounds = array<i64: 1, 128>}, {pipeline_mode = #tpu.pipeline_mode<synchronous>, transform_indices = @transform_3, window_bounds = array<i64: 128, 128>}, {pipeline_mode = #tpu.pipeline_mode<synchronous>, transform_indices = @transform_4, window_bounds = array<i64: 1, 128>}, {pipeline_mode = #tpu.pipeline_mode<synchronous>, transform_indices = @transform_5, window_bounds = array<i64: 128, 128>}, {pipeline_mode = #tpu.pipeline_mode<synchronous>, transform_indices = @transform_6, window_bounds = array<i64: 1, 128>}, {transform_indices = @transform_7, window_bounds = array<i64: 8, 2>}]} {
    %c0 = arith.constant 0 : index
    %c0_0 = arith.constant 0 : index
    %0 = vector.load %arg1[%c0, %c0_0] : memref<8x4xf32, #tpu.memory_space<vmem>>, vector<8x4xf32>
    %1 = arith.truncf %0 : vector<8x4xf32> to vector<8x4xbf16>
    %c0_1 = arith.constant 0 : index
    %c0_2 = arith.constant 0 : index
    %2 = vector.load %arg2[%c0_1, %c0_2] : memref<4x128xbf16, #tpu.memory_space<vmem>>, vector<4x128xbf16>
    %cst = arith.constant dense<0.000000e+00> : vector<8x128xf32>
    %3 = tpu.matmul %1, %2, %cst {dimension_numbers = #tpu.dot_dimension_numbers<[1], [0], [0], [1], [0, 0, 1, 1], [], []>} : vector<8x4xbf16>, vector<4x128xbf16>, vector<8x128xf32> -> vector<8x128xf32>
    %c0_3 = arith.constant 0 : index
    %c0_4 = arith.constant 0 : index
    %4 = vector.load %arg3[%c0_3, %c0_4] : memref<1x128xf32, #tpu.memory_space<vmem>>, vector<1x128xf32>
    %5 = vector.broadcast %4 : vector<1x128xf32> to vector<8x128xf32>
    %6 = arith.addf %3, %5 : vector<8x128xf32>
    %cst_5 = arith.constant 0.000000e+00 : f32
    %7 = vector.broadcast %cst_5 : f32 to vector<8x128xf32>
    %8 = arith.maximumf %6, %7 : vector<8x128xf32>
    %9 = arith.truncf %8 : vector<8x128xf32> to vector<8x128xbf16>
    %c0_6 = arith.constant 0 : index
    %c0_7 = arith.constant 0 : index
    %10 = vector.load %arg4[%c0_6, %c0_7] : memref<128x128xbf16, #tpu.memory_space<vmem>>, vector<128x128xbf16>
    %cst_8 = arith.constant dense<0.000000e+00> : vector<8x128xf32>
    %11 = tpu.matmul %9, %10, %cst_8 {dimension_numbers = #tpu.dot_dimension_numbers<[1], [0], [0], [1], [0, 0, 1, 1], [], []>} : vector<8x128xbf16>, vector<128x128xbf16>, vector<8x128xf32> -> vector<8x128xf32>
    %c0_9 = arith.constant 0 : index
    %c0_10 = arith.constant 0 : index
    %12 = vector.load %arg5[%c0_9, %c0_10] : memref<1x128xf32, #tpu.memory_space<vmem>>, vector<1x128xf32>
    %13 = vector.broadcast %12 : vector<1x128xf32> to vector<8x128xf32>
    %14 = arith.addf %11, %13 : vector<8x128xf32>
    %cst_11 = arith.constant 0.000000e+00 : f32
    %15 = vector.broadcast %cst_11 : f32 to vector<8x128xf32>
    %16 = arith.maximumf %14, %15 : vector<8x128xf32>
    %17 = arith.truncf %16 : vector<8x128xf32> to vector<8x128xbf16>
    %c0_12 = arith.constant 0 : index
    %c0_13 = arith.constant 0 : index
    %18 = vector.load %arg6[%c0_12, %c0_13] : memref<128x128xbf16, #tpu.memory_space<vmem>>, vector<128x128xbf16>
    %cst_14 = arith.constant dense<0.000000e+00> : vector<8x128xf32>
    %19 = tpu.matmul %17, %18, %cst_14 {dimension_numbers = #tpu.dot_dimension_numbers<[1], [0], [0], [1], [0, 0, 1, 1], [], []>} : vector<8x128xbf16>, vector<128x128xbf16>, vector<8x128xf32> -> vector<8x128xf32>
    %c0_15 = arith.constant 0 : index
    %c0_16 = arith.constant 0 : index
    %20 = vector.load %arg7[%c0_15, %c0_16] : memref<1x128xf32, #tpu.memory_space<vmem>>, vector<1x128xf32>
    %21 = vector.broadcast %20 : vector<1x128xf32> to vector<8x128xf32>
    %22 = arith.addf %19, %21 : vector<8x128xf32>
    %23 = vector.extract_strided_slice %22 {offsets = [0, 0], sizes = [8, 2], strides = [1, 1]} : vector<8x128xf32> to vector<8x2xf32>
    %c0_17 = arith.constant 0 : index
    %c0_18 = arith.constant 0 : index
    %24 = vector.load %arg8[%c0_17, %c0_18] : memref<8x2xf32, #tpu.memory_space<vmem>>, vector<8x2xf32>
    tpu.vector_store %arg8[%c0_17, %c0_18], %23 {strides = array<i32>} : memref<8x2xf32, #tpu.memory_space<vmem>>, vector<8x2xf32>,
    return
  }
  func.func @transform_0(%arg0: i32) -> (i32, i32) {
    %c0_i32 = arith.constant 0 : i32
    %c0_i32_0 = arith.constant 0 : i32
    return %arg0, %c0_i32 : i32, i32
  }
  func.func @transform_1(%arg0: i32) -> (i32, i32) {
    %c0_i32 = arith.constant 0 : i32
    %c0_i32_0 = arith.constant 0 : i32
    %c0_i32_1 = arith.constant 0 : i32
    return %c0_i32, %c0_i32_0 : i32, i32
  }
  func.func @transform_2(%arg0: i32) -> (i32, i32) {
    %c0_i32 = arith.constant 0 : i32
    %c0_i32_0 = arith.constant 0 : i32
    %c0_i32_1 = arith.constant 0 : i32
    return %c0_i32, %c0_i32_0 : i32, i32
  }
  func.func @transform_3(%arg0: i32) -> (i32, i32) {
    %c0_i32 = arith.constant 0 : i32
    %c0_i32_0 = arith.constant 0 : i32
    %c0_i32_1 = arith.constant 0 : i32
    return %c0_i32, %c0_i32_0 : i32, i32
  }
  func.func @transform_4(%arg0: i32) -> (i32, i32) {
    %c0_i32 = arith.constant 0 : i32
    %c0_i32_0 = arith.constant 0 : i32
    %c0_i32_1 = arith.constant 0 : i32
    return %c0_i32, %c0_i32_0 : i32, i32
  }
  func.func @transform_5(%arg0: i32) -> (i32, i32) {
    %c0_i32 = arith.constant 0 : i32
    %c0_i32_0 = arith.constant 0 : i32
    %c0_i32_1 = arith.constant 0 : i32
    return %c0_i32, %c0_i32_0 : i32, i32
  }
  func.func @transform_6(%arg0: i32) -> (i32, i32) {
    %c0_i32 = arith.constant 0 : i32
    %c0_i32_0 = arith.constant 0 : i32
    %c0_i32_1 = arith.constant 0 : i32
    return %c0_i32, %c0_i32_0 : i32, i32
  }
  func.func @transform_7(%arg0: i32) -> (i32, i32) {
    %c0_i32 = arith.constant 0 : i32
    %c0_i32_0 = arith.constant 0 : i32
    return %arg0, %c0_i32 : i32, i32
  }
}

</mosaic_0001>

<bundles_post_ra>
// kernel: tpu_custom_call.1
= control target key start
LH: loop header
LB: loop body
LE: loop exit
PB: predicated region body
PF: predicated region fallthrough
CT: control target
= control target key end

     0   :  { %12 = vsyncpa [#allocation3], 0  ;;  %s469_s0 = inlined_call_operand.vmem [shape: f32[8,4], index: 0, kind: input, shape index: {}]   ;;  %s470_s1 = inlined_call_operand.vmem [shape: bf16[4,128], index: 1, kind: input, shape index: {}]   ;;  %s471_s2 = inlined_call_operand.vmem [shape: f32[1,128], index: 2, kind: input, shape index: {}]   ;;  %s472_s3 = inlined_call_operand.hbm [shape: bf16[128,128], index: 3, kind: input, shape index: {}]   ;;  %s473_s4 = inlined_call_operand.vmem [shape: f32[1,128], index: 4, kind: input, shape index: {}]   ;;  %s474_s5 = inlined_call_operand.hbm [shape: bf16[128,128], index: 5, kind: input, shape index: {}]   ;;  %s475_s6 = inlined_call_operand.vmem [shape: f32[1,128], index: 6, kind: input, shape index: {}]   ;;  %s476_s7 = inlined_call_operand.vmem [shape: f32[8,2], index: 7, kind: output, shape index: {}]  }
   0x1   :  { %s24_s26 = sshll.u32 %s472_s3, 4  ;;  %s25_s26 = int_to_ptr.hbm [resolvable:$true] %s24_s26 }
   0x2   :  { %13 = vsyncpa [#allocation5], 0  ;;  %s401_s27 = smov [#allocation2]   ;;  %s39_s8 = sshll.u32 %s474_s5, 4  ;;  %s40_s8 = int_to_ptr.hbm [resolvable:$true] %s39_s8 }
   0x3   :  { %s26_s28 = sshll.u32 %s401_s27, 4  ;;  %s402_s9 = smov 64   ;;  %s27_s28 = int_to_ptr.vmem [resolvable:$true] %s26_s28 }
   0x4   :  { %s403_s10 = smov 4   ;;  %s404_s11 = smov [#allocation4]  }
   0x5   :  { %32 = dma.hbm_to_vmem [thread:$0]  %s25_s26, 1024, %s27_s28, [#allocation3], %s402_s9, %s402_s9, %s403_s10  }
   0x6   :  { %s41_s12 = sshll.u32 %s404_s11, 4  ;;  %s42_s12 = int_to_ptr.vmem [resolvable:$true] %s41_s12 }
   0x7   :  { %47 = dma.hbm_to_vmem [thread:$0]  %s40_s8, 1024, %s42_s12, [#allocation5], %s402_s9, %s402_s9, %s403_s10  }
   0x8   :  { %397 = dma.done.wait [#allocation3], 1024  }
   0x9   :  { %398 = vsyncadd [#allocation3], 4294966272 }
   0xa   :  { %399 = dma.done.wait [#allocation5], 1024  }
   0xb   :  { %400 = vsyncadd [#allocation5], 4294966272  ;;  %vm70_vm0 = vcmask 1041408   ;;  %v61_v0 = vld [vmem:[%s470_s1] sm:$0x3]  ;;  %v333_v2 = vld [vmem:[#allocation2 + $0x38] sm:$0xff] }
   0xc   :  { %v59_v1 = vld [vmem:[%s469_s0] sm:$0xff]  ;;  %v72_v3 = vsel %vm70_vm0, %v61_v0, 0  ;;  %vm66_vm1 = vcmask 31744   ;;  %157 = vmatpush.bf16.msra.mxu1 %v333_v2  ;;  %v332_v5 = vld [vmem:[#allocation2 + $0x30] sm:$0xff]  ;;  %v331_v6 = vld [vmem:[#allocation2 + $0x28] sm:$0xff]  ;;  %vm253_vm2 = vcmask 15360  }
   0xd   :  { %v60_v4 = vpack.c.bf16 %v59_v1, %v59_v1  ;;  %81 = vmatpush.bf16.msra.mxu0 %v72_v3  ;;  %v330_v7 = vld [vmem:[#allocation2 + $0x20] sm:$0xff]  ;;  %v329_v8 = vld [vmem:[#allocation2 + $0x18] sm:$0xff]  ;;  %v328_v9 = vld [vmem:[#allocation2 + $0x10] sm:$0xff] }
   0xe   :  { %v327_v10 = vld [vmem:[#allocation2 + $0x8] sm:$0xff]  ;;  %v326_v11 = vld [vmem:[#allocation2] sm:$0xff]  ;;  %v341_v12 = vld [vmem:[#allocation4 + $0x38] sm:$0xff] }
   0xf   :  { %240 = vmatpush.bf16.msra.mxu2 %v341_v12  ;;  %v340_v13 = vld [vmem:[#allocation4 + $0x30] sm:$0xff]  ;;  %v339_v14 = vld [vmem:[#allocation4 + $0x28] sm:$0xff]  ;;  %v338_v15 = vld [vmem:[#allocation4 + $0x20] sm:$0xff] }
  0x10   :  { %261 = vmatmul.msk.bf16.vlgmr.msra.gmra.mxu0 %vm66_vm1, %v60_v4  ;;  %158 = vmatpush.bf16.msra.mxu1 %v332_v5  ;;  %v337_v16 = vld [vmem:[#allocation4 + $0x18] sm:$0xff]  ;;  %v336_v17 = vld [vmem:[#allocation4 + $0x10] sm:$0xff]  ;;  %v346_v18 = vld [vmem:[%s471_s2] ss:$0 sm:$0xff] }
  0x11   :  { %v335_v24 = vld [vmem:[#allocation4 + $0x8] sm:$0xff]  ;;  %v334_v25 = vld [vmem:[#allocation4] sm:$0xff] }
  0x12   :  { %v347_v26 = vld [vmem:[%s473_s4] ss:$0 sm:$0xff] }
  0x13   :  { %241 = vmatpush.bf16.msra.mxu2 %v340_v13  ;;  %v348_v32 = vld [vmem:[%s475_s6] ss:$0 sm:$0xff] }
  0x14   :  { %159 = vmatpush.bf16.msra.mxu1 %v331_v6 }
  0x17   :  { %242 = vmatpush.bf16.msra.mxu2 %v339_v14 }
  0x18   :  { %160 = vmatpush.bf16.msra.mxu1 %v330_v7 }
  0x1b   :  { %243 = vmatpush.bf16.msra.mxu2 %v338_v15 }
  0x1c   :  { %161 = vmatpush.bf16.msra.mxu1 %v329_v8 }
  0x1f   :  { %244 = vmatpush.bf16.msra.mxu2 %v337_v16 }
  0x20   :  { %162 = vmatpush.bf16.msra.mxu1 %v328_v9 }
  0x23   :  { %245 = vmatpush.bf16.msra.mxu2 %v336_v17 }
  0x24   :  { %163 = vmatpush.bf16.msra.mxu1 %v327_v10 }
  0x27   :  { %246 = vmatpush.bf16.msra.mxu2 %v335_v24 }
  0x28   :  { %164 = vmatpush.bf16.msra.mxu1 %v326_v11 }
  0x2b   :  { %247 = vmatpush.bf16.msra.mxu2 %v334_v25 }
  0x8d   :  { %v83_v19 = vpop.f32.mrf.mxu0 }
  0x8e   :  { %v84_v20 = vadd.f32 %v346_v18, %v83_v19 }
  0x90   :  { %v87_v21 = vmax.f32 %v84_v20, 0.0 }
  0x92   :  { %v88_v22 = vpack.c.bf16 %v87_v21, %v87_v21 }
  0x94   :  { %165 = vmatmul.bf16.vlgmr.msra.gmra.mxu1 %v88_v22 }
  0x95   :  { %v85_v23 = vpop.f32.mrf.mxu0 }
 0x111   :  { %v166_v27 = vpop.f32.mrf.mxu1 }
 0x112   :  { %v167_v28 = vadd.f32 %v347_v26, %v166_v27 }
 0x114   :  { %v170_v29 = vmax.f32 %v167_v28, 0.0 }
 0x116   :  { %v171_v30 = vpack.c.bf16 %v170_v29, %v170_v29 }
 0x118   :  { %248 = vmatmul.bf16.vlgmr.msra.gmra.mxu2 %v171_v30 }
 0x119   :  { %v168_v31 = vpop.f32.mrf.mxu1 }
 0x19b   :  { %v249_v33 = vpop.f32.mrf.mxu2 }
 0x19c   :  { %v250_v34 = vadd.f32 %v348_v32, %v249_v33 }
 0x19e   :  { %254 = vst.msk [vmem:[%s476_s7] sm:$0xff] %vm253_vm2, %v250_v34 }
 0x1a3   :  { %v251_v35 = vpop.f32.mrf.mxu2 }
 0x1a4   :  { %259 = vsyncpa [#allocation3], 1 }
 0x1a5   :  { %260 = vsyncpa [#allocation5], 1 }

</bundles_post_ra>
